<compile_context>
chip_gen: v6e
topology: v6e:2x2x1
jax: 0.10.0
libtpu: 0.0.40
codegen_flags: <defaults>
</compile_context>

<pallas_src>
import jax
import jax.numpy as jnp
from jax.experimental import pallas as pl
from jax.experimental.pallas import tpu as pltpu


def _replicate_kernel(x_ref, o_ref):
    # x_ref: (tr, lanes); o_ref: (num_channels, tr, lanes).
    # Load the tile once, store it into every channel replica.
    x = x_ref[...]
    for c in range(o_ref.shape[0]):          # static unroll over replicas
        o_ref[c] = x


def mono_to_color(x: jax.Array, num_channels: int = 3,
                  *, block_bytes: int = 4 * 1024 * 1024,
                  min_pallas_bytes: int = 1024 * 1024) -> jax.Array:
    """Pallas implementation of torch `tensor.repeat(num_channels, 1, 1)` for 3-D x."""
    C, H, W = x.shape
    dtype = x.dtype
    dsize = jnp.dtype(dtype).itemsize
    n_elems = C * H * W
    total_bytes = (1 + num_channels) * n_elems * dsize

    # Tiny inputs or lane-sparse shapes: XLA's tile/broadcast is cheaper than a
    # pallas_call launch or masked vst.msk stores.
    if total_bytes < min_pallas_bytes or n_elems % 128 != 0:
        return jnp.tile(x, (num_channels, 1, 1))

    # ---- Lane-dense 2-D view: last dim a multiple of 128 (up to 4096). ----
    lanes = 128
    while lanes * 2 <= 4096 and n_elems % (lanes * 2) == 0:
        lanes *= 2
    rows = n_elems // lanes
    x2 = x.reshape(rows, lanes)

    # ---- Row tile: target block_bytes, but cap the double-buffered footprint
    # 2*(1+N)*tile at ~24 MiB so it fits every generation's scoped VMEM. ----
    vmem_budget = 24 * 1024 * 1024
    tile_bytes = min(block_bytes,
                     max(vmem_budget // (2 * (1 + num_channels)), lanes * dsize))
    sublane = {4: 8, 2: 16, 1: 32}.get(dsize, 8)
    tr = max(1, tile_bytes // (lanes * dsize))
    tr = (tr // sublane) * sublane
    tr = max(tr, min(rows, sublane))   # never below one sublane group (or full rows)
    tr = min(tr, rows)                 # full extent for small inputs

    # Ensure >= 2 spatial tiles when possible so both v7x TensorCores get work.
    if pl.cdiv(rows, tr) == 1 and rows >= 2 * sublane:
        tr = max(sublane, ((rows // 2) // sublane) * sublane)
    n_row_tiles = pl.cdiv(rows, tr)

    # Explicit VMEM limit: actual footprint + headroom, >= the smallest default,
    # <= v7x's 32 MiB scoped budget.
    footprint = 2 * (1 + num_channels) * tr * lanes * dsize
    vmem_limit = min(32 * 1024 * 1024,
                     max(16 * 1024 * 1024, footprint + 4 * 1024 * 1024))

    out3 = jax.ShapeDtypeStruct((num_channels, rows, lanes), dtype)

    grid_spec = pltpu.PrefetchScalarGridSpec(
        num_scalar_prefetch=0,
        grid=(n_row_tiles,),
        in_specs=[pl.BlockSpec((tr, lanes), lambda s: (s, 0))],
        out_specs=pl.BlockSpec((num_channels, tr, lanes), lambda s: (0, s, 0)),
    )

    y3 = pl.pallas_call(
        _replicate_kernel,
        out_shape=out3,
        grid_spec=grid_spec,
        compiler_params=pltpu.CompilerParams(
            dimension_semantics=("parallel",),
            vmem_limit_bytes=vmem_limit,
        ),
        cost_estimate=pl.CostEstimate(
            flops=0,
            transcendentals=0,
            bytes_accessed=total_bytes,
        ),
    )(x2)

    # (num_channels, rows, lanes) -> (num_channels * C, H, W); order-preserving.
    return y3.reshape(num_channels * C, H, W)


if __name__ == "__main__":
    key = jax.random.PRNGKey(0)
    k0, k1, k2, k3 = jax.random.split(key, 4)
    num_channels = 3

    # 1) Typical mono image (C=1, H=16, W=16): tiny-input bypass path.
    x = jax.random.normal(k0, (1, 16, 16), dtype=jnp.float32)
    y = jax.block_until_ready(mono_to_color(x, num_channels=num_channels))
    assert y.shape == (num_channels, 16, 16), y.shape
    assert y.dtype == x.dtype
    assert jnp.array_equal(y, jnp.tile(x, (num_channels, 1, 1))), \
        "mismatch vs reference tile (tiny bypass)"

    # 2) Pallas path with default sizing: lane-dense slab, channel-folded
    #    output, >= 2 spatial tiles.
    xa = jax.random.normal(k1, (4, 128, 256), dtype=jnp.float32)
    ya = jax.block_until_ready(mono_to_color(xa, num_channels=num_channels))
    assert ya.shape == (num_channels * 4, 128, 256), ya.shape
    assert jnp.array_equal(ya, jnp.tile(xa, (num_channels, 1, 1))), \
        "mismatch vs reference tile (pallas path)"

    # 3) Pallas path, multi-tile + ragged boundary (15 rows of 1024 lanes,
    #    tile of 8 rows -> last block partial).
    xb = jax.random.normal(k2, (3, 40, 128), dtype=jnp.float32)
    yb = jax.block_until_ready(
        mono_to_color(xb, num_channels=num_channels,
                      block_bytes=16 * 1024, min_pallas_bytes=0))
    assert jnp.array_equal(yb, jnp.tile(xb, (num_channels, 1, 1))), \
        "mismatch vs reference tile (ragged multi-tile)"

    # 4) Non-128-divisible element count -> jnp.tile fallback.
    xc = jax.random.normal(k3, (2, 5, 7), dtype=jnp.float32)
    yc = jax.block_until_ready(
        mono_to_color(xc, num_channels=num_channels, min_pallas_bytes=0))
    assert jnp.array_equal(yc, jnp.tile(xc, (num_channels, 1, 1))), \
        "mismatch vs reference tile (fallback layout)"

    print("KERNEL_OK")
</pallas_src>

<mosaic_0001>
module attributes {stable_mosaic.version = 11 : i64} {
  func.func @_replicate_kernel(%arg0: i32, %arg1: memref<16x4096xf32, #tpu.memory_space<vmem>>, %arg2: memref<3x16x4096xf32, #tpu.memory_space<vmem>>) attributes {dimension_semantics = [#tpu.dimension_semantics<parallel>], iteration_bounds = array<i64: 2>, scalar_prefetch = 0 : i64, scratch_operands = 0 : i64, tpu.core_type = #tpu.core_type<tc>, window_params = [{transform_indices = @transform_0, window_bounds = array<i64: 16, 4096>}, {transform_indices = @transform_1, window_bounds = array<i64: 3, 16, 4096>}]} {
    %c0 = arith.constant 0 : index
    %c0_0 = arith.constant 0 : index
    %0 = vector.load %arg1[%c0, %c0_0] : memref<16x4096xf32, #tpu.memory_space<vmem>>, vector<16x4096xf32>
    %c0_1 = arith.constant 0 : index
    %c0_2 = arith.constant 0 : index
    %c0_3 = arith.constant 0 : index
    %1 = vector.load %arg2[%c0_1, %c0_2, %c0_3] : memref<3x16x4096xf32, #tpu.memory_space<vmem>>, vector<1x16x4096xf32>
    %2 = vector.shape_cast %1 : vector<1x16x4096xf32> to vector<16x4096xf32>
    %3 = vector.shape_cast %0 : vector<16x4096xf32> to vector<1x16x4096xf32>
    tpu.vector_store %arg2[%c0_1, %c0_2, %c0_3], %3 {strides = array<i32>} : memref<3x16x4096xf32, #tpu.memory_space<vmem>>, vector<1x16x4096xf32>,
    %c1 = arith.constant 1 : index
    %c0_4 = arith.constant 0 : index
    %c0_5 = arith.constant 0 : index
    %4 = vector.load %arg2[%c1, %c0_4, %c0_5] : memref<3x16x4096xf32, #tpu.memory_space<vmem>>, vector<1x16x4096xf32>
    %5 = vector.shape_cast %4 : vector<1x16x4096xf32> to vector<16x4096xf32>
    %6 = vector.shape_cast %0 : vector<16x4096xf32> to vector<1x16x4096xf32>
    tpu.vector_store %arg2[%c1, %c0_4, %c0_5], %6 {strides = array<i32>} : memref<3x16x4096xf32, #tpu.memory_space<vmem>>, vector<1x16x4096xf32>,
    %c2 = arith.constant 2 : index
    %c0_6 = arith.constant 0 : index
    %c0_7 = arith.constant 0 : index
    %7 = vector.load %arg2[%c2, %c0_6, %c0_7] : memref<3x16x4096xf32, #tpu.memory_space<vmem>>, vector<1x16x4096xf32>
    %8 = vector.shape_cast %7 : vector<1x16x4096xf32> to vector<16x4096xf32>
    %9 = vector.shape_cast %0 : vector<16x4096xf32> to vector<1x16x4096xf32>
    tpu.vector_store %arg2[%c2, %c0_6, %c0_7], %9 {strides = array<i32>} : memref<3x16x4096xf32, #tpu.memory_space<vmem>>, vector<1x16x4096xf32>,
    return
  }
  func.func @transform_0(%arg0: i32) -> (i32, i32) {
    %c0_i32 = arith.constant 0 : i32
    %c0_i32_0 = arith.constant 0 : i32
    return %arg0, %c0_i32 : i32, i32
  }
  func.func @transform_1(%arg0: i32) -> (i32, i32, i32) {
    %c0_i32 = arith.constant 0 : i32
    %c0_i32_0 = arith.constant 0 : i32
    %c0_i32_1 = arith.constant 0 : i32
    return %c0_i32, %arg0, %c0_i32_0 : i32, i32, i32
  }
}

</mosaic_0001>

<bundles_post_ra>
// kernel: tpu_custom_call.1
= control target key start
LH: loop header
LB: loop body
LE: loop exit
PB: predicated region body
PF: predicated region fallthrough
CT: control target
= control target key end

     0   :  { %6 = vsyncpa [#allocation3], 0  ;;  %s1207_s0 = inlined_call_operand.hbm [shape: f32[32,4096], index: 0, kind: input, shape index: {}]   ;;  %s1208_s1 = inlined_call_operand.hbm [shape: f32[3,32,4096], index: 1, kind: output, shape index: {}]  }
   0x1   :  { %8 = vsyncpa [#allocation3 + $0x1], 0 }
   0x2   :  { %9 = vsyncpa [#allocation4], 0 }
   0x3   :  { %11 = vsyncpa [#allocation4 + $0x1], 0  ;;  %s803_s6 = smov 0   ;;  %s805_s7 = smov 0  }
   0x4   :  { %s807_s8 = smov 0   ;;  %s809_s9 = smov 0  }
   0x5 LB: > { %s824_s10 = sadd.s32 4294967295, %s781_s9   ;;  %s507_s11 = sadd.s32 4294967294, %s781_s9   ;;  %s781_s9 = sphi %s809_s9, %s1223_s9   ;;  %s777_s8 = sphi %s807_s8, %s1222_s8   ;;  %s773_s7 = sphi %s805_s7, %s1221_s7   ;;  %s769_s6 = sphi %s803_s6, %s1220_s6  }
   0x6   : > { %s828_s12 = sadd.s32 1, %s781_s9   ;;  %s24_s13 = sadd.s32 1, %s777_s8 }
   0x7   : > { %s21_s14 = ssub.s32 %s781_s9, %s828_s12  ;;  %p31_p0 = scmp.ne.s32.totalorder %s777_s8, %s773_s7 }
   0x8   : > { %p22_p1 = scmp.eq.s32.totalorder %s21_s14, 0  ;;  %p32_p2 = scmp.eq.s32.totalorder %s781_s9, 0 }
   0x9   : > { %p37_p3 = scmp.ne.s32.totalorder %s773_s7, %s769_s6  ;;  %p38_p4 = scmp.eq.s32.totalorder %s824_s10, 0 }
   0xa   : > { %s840_s15 = scalar_select %p22_p1, %s777_s8, %s24_s13  }
   0xb   : > { %p842_p5 = por %p32_p2, %p31_p0  ;;  %p846_p6 = por %p38_p4, %p37_p3 }
   0xc   : > { %p61_p7 = scmp.eq.s32.totalorder %s824_s10, 1  ;;  %p67_p8 = scmp.eq.s32.totalorder %s507_s11, 1 }
   0xd   : > { %s1212_s17 = scalar_select %p846_p6, 1, 0 }
   0xe   : > { %p672_p10 = scmp.lt.s32.totalorder %s781_s9, 2  ;;  %p853_p11 = por %p61_p7, %p31_p0 }
   0xf   : > { %p857_p12 = por %p67_p8, %p37_p3  ;;  %s87_s20 = sand.u32 1, %s777_s8  }
  0x10   : > { %s1213_s18 = scalar_select %p853_p11, 1, 0 }
  0x11   : > { %s1214_s19 = scalar_select %p857_p12, 1, 0 }
  0x12   : > { %s650_s21 = sshll.u32 %s781_s9, 13  ;;  %s510_s22 = sshll.u32 %s87_s20, 9 }
  0x13   : > { %s866_s25 = scalar_lea.hbm %s1207_s0, %s650_s21  ;;  %s91_s26 = scalar_lea.vmem [#allocation2], %s510_s22 }
  0x14   : > { %s99_s27 = sshll.u32 %s91_s26, 4  ;;  %p870_p13 = pnand %p672_p10, %p842_p5  ;;  %s874_s27 = int_to_ptr.vmem [resolvable:$true] %s99_s27 }
  0x15   : > { %s876_s29 = scalar_lea.sflag [#allocation3], %s87_s20  ;;  %s715_s30 = scalar_lea.hbm %s866_s25, 8192 }
  0x16   : > { %p716_p0 = scmp.ne.s32.totalorder %s866_s25, %s715_s30  ;;  %p717_p1 = pneg %p870_p13 }
  0x17   : > { %s720_s4 = scalar_lea.hbm %s1207_s0, 16384  ;;  %p721_p4 = scmp.lt.s32.totalorder %s866_s25, %s1207_s0 }
  0x18   : > { %p718_p2 = pnand %p717_p1, %p716_p0  ;;  %p722_p5 = scmp.lt.s32.totalorder %s720_s4, %s715_s30 }
  0x1a   : > { %p719_p3 = pneg %p718_p2  ;;  %p723_p7 = por %p722_p5, %p721_p4 }
  0x1c   : > { %p724_p8 = pnand %p723_p7, %p719_p3 }
  0x1e   : > { %727 = shalt.err (!%p724_p8)
}
  0x1f   : > { %s728_s13 = scalar_lea.vmem %s874_s27, 8192  ;;  %s783_s14 = smov [#allocation2]  }
  0x20   : > { %p729_p10 = scmp.ne.s32.totalorder %s874_s27, %s728_s13  ;;  %s733_s16 = sshll.u32 %s783_s14, 4  ;;  %s734_s16 = int_to_ptr.vmem [resolvable:$false] %s733_s16 }
  0x21   : > { %s735_s20 = scalar_lea.vmem %s734_s16, 16384  ;;  %p736_p2 = scmp.lt.s32.totalorder %s874_s27, %s734_s16 }
  0x22   : > { %p731_p9 = pnand %p729_p10, %p717_p1  ;;  %p737_p12 = scmp.lt.s32.totalorder %s735_s20, %s728_s13 }
  0x24   : > { %p732_p0 = pneg %p731_p9  ;;  %p738_p11 = por %p737_p12, %p736_p2 }
  0x26   : > { %p739_p6 = pnand %p738_p11, %p732_p0 }
  0x28   : > { %742 = shalt.err (!%p739_p6)
}
  0x29   : > { %s784_s21 = smov 4096   ;;  %s785_s22 = smov 256  }
  0x2a   : > { %667 = dma.hbm_to_vmem [thread:$0]  (!%p870_p13), %s866_s25, 8192, %s874_s27, %s876_s29, %s784_s21, %s784_s21, %s785_s22  }
  0x2b   : > { %p514_p9 = scmp.ge.s32.totalorder %s781_s9, 1  ;;  %p107_p1 = scmp.lt.s32.totalorder %s781_s9, 3 }
  0x2d   : > { %p108_p3 = pnand %p514_p9, %p107_p1 }
  0x2e   : > { %s900_s23 = sand.u32 (!%p108_p3), 1, %s773_s7   ;;  %p1216_p6 = scmp.ne.s32.totalorder (!%p108_p3), %s1212_s17, 0 }
  0x2f   : > { %111 = sbr.rel (%p108_p3) target bundleno = 163 (0xa3), region = 24  ;;  %s515_s24 = sshll.u32 (!%p108_p3), %s900_s23, 9 }
  0x30   : > { %s114_s26 = scalar_lea.sflag (!%p108_p3), [#allocation3], %s900_s23  ;;  %s904_s30 = scalar_lea.vmem (!%p108_p3), [#allocation2], %s515_s24 }
  0x34   : > { %760 = dma.done.wait (%p1216_p6), %s114_s26, 8192  }
  0x35   : > { %762 = vsyncadd (%p1216_p6), %s114_s26, 4294959104  ;;  %s653_s25 = smul.u32 1536, %s900_s23  ;;  %v138_v0 = vld [vmem:[%s904_s30] sm:$0xff]  ;;  %v139_v1 = vld [vmem:[%s904_s30 + $0x8] sm:$0xff]  ;;  %s397_s17 = scalar_lea.sflag [#allocation4], %s900_s23 }
  0x36   : > { %v140_v2 = vld [vmem:[%s904_s30 + $0x10] sm:$0xff]  ;;  %v141_v3 = vld [vmem:[%s904_s30 + $0x18] sm:$0xff]  ;;  %v142_v4 = vld [vmem:[%s904_s30 + $0x20] sm:$0xff] }
  0x37   : > { %s914_s27 = scalar_lea.vmem [#allocation5], %s653_s25  ;;  %v143_v5 = vld [vmem:[%s904_s30 + $0x28] sm:$0xff]  ;;  %v144_v6 = vld [vmem:[%s904_s30 + $0x30] sm:$0xff]  ;;  %v145_v7 = vld [vmem:[%s904_s30 + $0x38] sm:$0xff] }
  0x38   : > { %202 = vst [vmem:[%s914_s27] sm:$0xff] %v138_v0  ;;  %516 = vst [vmem:[%s914_s27 + $0x200] sm:$0xff] %v138_v0  ;;  %v146_v8 = vld [vmem:[%s904_s30 + $0x40] sm:$0xff]  ;;  %v147_v9 = vld [vmem:[%s904_s30 + $0x48] sm:$0xff] }
  0x39   : > { %580 = vst [vmem:[%s914_s27 + $0x400] sm:$0xff] %v138_v0  ;;  %203 = vst [vmem:[%s914_s27 + $0x8] sm:$0xff] %v139_v1  ;;  %v148_v10 = vld [vmem:[%s904_s30 + $0x50] sm:$0xff]  ;;  %v149_v11 = vld [vmem:[%s904_s30 + $0x58] sm:$0xff] }
  0x3a   : > { %517 = vst [vmem:[%s914_s27 + $0x208] sm:$0xff] %v139_v1  ;;  %581 = vst [vmem:[%s914_s27 + $0x408] sm:$0xff] %v139_v1  ;;  %v150_v12 = vld [vmem:[%s904_s30 + $0x60] sm:$0xff]  ;;  %v151_v13 = vld [vmem:[%s904_s30 + $0x68] sm:$0xff] }
  0x3b   : > { %204 = vst [vmem:[%s914_s27 + $0x10] sm:$0xff] %v140_v2  ;;  %518 = vst [vmem:[%s914_s27 + $0x210] sm:$0xff] %v140_v2  ;;  %v152_v14 = vld [vmem:[%s904_s30 + $0x70] sm:$0xff]  ;;  %v153_v15 = vld [vmem:[%s904_s30 + $0x78] sm:$0xff] }
  0x3c   : > { %582 = vst [vmem:[%s914_s27 + $0x410] sm:$0xff] %v140_v2  ;;  %205 = vst [vmem:[%s914_s27 + $0x18] sm:$0xff] %v141_v3  ;;  %v154_v16 = vld [vmem:[%s904_s30 + $0x80] sm:$0xff]  ;;  %v155_v17 = vld [vmem:[%s904_s30 + $0x88] sm:$0xff] }
  0x3d   : > { %519 = vst [vmem:[%s914_s27 + $0x218] sm:$0xff] %v141_v3  ;;  %583 = vst [vmem:[%s914_s27 + $0x418] sm:$0xff] %v141_v3  ;;  %v156_v18 = vld [vmem:[%s904_s30 + $0x90] sm:$0xff]  ;;  %v157_v19 = vld [vmem:[%s904_s30 + $0x98] sm:$0xff] }
  0x3e   : > { %206 = vst [vmem:[%s914_s27 + $0x20] sm:$0xff] %v142_v4  ;;  %520 = vst [vmem:[%s914_s27 + $0x220] sm:$0xff] %v142_v4  ;;  %v158_v20 = vld [vmem:[%s904_s30 + $0xa0] sm:$0xff]  ;;  %v159_v21 = vld [vmem:[%s904_s30 + $0xa8] sm:$0xff] }
  0x3f   : > { %584 = vst [vmem:[%s914_s27 + $0x420] sm:$0xff] %v142_v4  ;;  %207 = vst [vmem:[%s914_s27 + $0x28] sm:$0xff] %v143_v5  ;;  %v160_v22 = vld [vmem:[%s904_s30 + $0xb0] sm:$0xff]  ;;  %v161_v23 = vld [vmem:[%s904_s30 + $0xb8] sm:$0xff] }
  0x40   : > { %521 = vst [vmem:[%s914_s27 + $0x228] sm:$0xff] %v143_v5  ;;  %585 = vst [vmem:[%s914_s27 + $0x428] sm:$0xff] %v143_v5  ;;  %v162_v24 = vld [vmem:[%s904_s30 + $0xc0] sm:$0xff]  ;;  %v163_v25 = vld [vmem:[%s904_s30 + $0xc8] sm:$0xff] }
  0x41   : > { %208 = vst [vmem:[%s914_s27 + $0x30] sm:$0xff] %v144_v6  ;;  %522 = vst [vmem:[%s914_s27 + $0x230] sm:$0xff] %v144_v6  ;;  %v164_v26 = vld [vmem:[%s904_s30 + $0xd0] sm:$0xff]  ;;  %v165_v27 = vld [vmem:[%s904_s30 + $0xd8] sm:$0xff] }
  0x42   : > { %586 = vst [vmem:[%s914_s27 + $0x430] sm:$0xff] %v144_v6  ;;  %209 = vst [vmem:[%s914_s27 + $0x38] sm:$0xff] %v145_v7  ;;  %v166_v28 = vld [vmem:[%s904_s30 + $0xe0] sm:$0xff]  ;;  %v167_v29 = vld [vmem:[%s904_s30 + $0xe8] sm:$0xff] }
  0x43   : > { %523 = vst [vmem:[%s914_s27 + $0x238] sm:$0xff] %v145_v7  ;;  %587 = vst [vmem:[%s914_s27 + $0x438] sm:$0xff] %v145_v7  ;;  %v168_v30 = vld [vmem:[%s904_s30 + $0xf0] sm:$0xff]  ;;  %v169_v31 = vld [vmem:[%s904_s30 + $0xf8] sm:$0xff] }
  0x44   : > { %210 = vst [vmem:[%s914_s27 + $0x40] sm:$0xff] %v146_v8  ;;  %524 = vst [vmem:[%s914_s27 + $0x240] sm:$0xff] %v146_v8  ;;  %v170_v32 = vld [vmem:[%s904_s30 + $0x100] sm:$0xff]  ;;  %v171_v33 = vld [vmem:[%s904_s30 + $0x108] sm:$0xff] }
  0x45   : > { %588 = vst [vmem:[%s914_s27 + $0x440] sm:$0xff] %v146_v8  ;;  %211 = vst [vmem:[%s914_s27 + $0x48] sm:$0xff] %v147_v9  ;;  %v172_v34 = vld [vmem:[%s904_s30 + $0x110] sm:$0xff]  ;;  %v173_v35 = vld [vmem:[%s904_s30 + $0x118] sm:$0xff] }
  0x46   : > { %525 = vst [vmem:[%s914_s27 + $0x248] sm:$0xff] %v147_v9  ;;  %589 = vst [vmem:[%s914_s27 + $0x448] sm:$0xff] %v147_v9  ;;  %v174_v36 = vld [vmem:[%s904_s30 + $0x120] sm:$0xff]  ;;  %v175_v37 = vld [vmem:[%s904_s30 + $0x128] sm:$0xff] }
  0x47   : > { %212 = vst [vmem:[%s914_s27 + $0x50] sm:$0xff] %v148_v10  ;;  %526 = vst [vmem:[%s914_s27 + $0x250] sm:$0xff] %v148_v10  ;;  %v176_v38 = vld [vmem:[%s904_s30 + $0x130] sm:$0xff]  ;;  %v177_v39 = vld [vmem:[%s904_s30 + $0x138] sm:$0xff] }
  0x48   : > { %590 = vst [vmem:[%s914_s27 + $0x450] sm:$0xff] %v148_v10  ;;  %213 = vst [vmem:[%s914_s27 + $0x58] sm:$0xff] %v149_v11  ;;  %v178_v40 = vld [vmem:[%s904_s30 + $0x140] sm:$0xff]  ;;  %v179_v41 = vld [vmem:[%s904_s30 + $0x148] sm:$0xff] }
  0x49   : > { %527 = vst [vmem:[%s914_s27 + $0x258] sm:$0xff] %v149_v11  ;;  %591 = vst [vmem:[%s914_s27 + $0x458] sm:$0xff] %v149_v11  ;;  %v180_v42 = vld [vmem:[%s904_s30 + $0x150] sm:$0xff]  ;;  %v181_v43 = vld [vmem:[%s904_s30 + $0x158] sm:$0xff] }
  0x4a   : > { %214 = vst [vmem:[%s914_s27 + $0x60] sm:$0xff] %v150_v12  ;;  %528 = vst [vmem:[%s914_s27 + $0x260] sm:$0xff] %v150_v12  ;;  %v182_v44 = vld [vmem:[%s904_s30 + $0x160] sm:$0xff]  ;;  %v183_v45 = vld [vmem:[%s904_s30 + $0x168] sm:$0xff] }
  0x4b   : > { %592 = vst [vmem:[%s914_s27 + $0x460] sm:$0xff] %v150_v12  ;;  %215 = vst [vmem:[%s914_s27 + $0x68] sm:$0xff] %v151_v13  ;;  %v184_v46 = vld [vmem:[%s904_s30 + $0x170] sm:$0xff]  ;;  %v185_v47 = vld [vmem:[%s904_s30 + $0x178] sm:$0xff] }
  0x4c   : > { %529 = vst [vmem:[%s914_s27 + $0x268] sm:$0xff] %v151_v13  ;;  %593 = vst [vmem:[%s914_s27 + $0x468] sm:$0xff] %v151_v13  ;;  %v186_v48 = vld [vmem:[%s904_s30 + $0x180] sm:$0xff]  ;;  %v187_v49 = vld [vmem:[%s904_s30 + $0x188] sm:$0xff] }
  0x4d   : > { %216 = vst [vmem:[%s914_s27 + $0x70] sm:$0xff] %v152_v14  ;;  %530 = vst [vmem:[%s914_s27 + $0x270] sm:$0xff] %v152_v14  ;;  %v188_v50 = vld [vmem:[%s904_s30 + $0x190] sm:$0xff]  ;;  %v189_v51 = vld [vmem:[%s904_s30 + $0x198] sm:$0xff] }
  0x4e   : > { %594 = vst [vmem:[%s914_s27 + $0x470] sm:$0xff] %v152_v14  ;;  %217 = vst [vmem:[%s914_s27 + $0x78] sm:$0xff] %v153_v15  ;;  %v190_v52 = vld [vmem:[%s904_s30 + $0x1a0] sm:$0xff]  ;;  %v191_v53 = vld [vmem:[%s904_s30 + $0x1a8] sm:$0xff] }
  0x4f   : > { %531 = vst [vmem:[%s914_s27 + $0x278] sm:$0xff] %v153_v15  ;;  %595 = vst [vmem:[%s914_s27 + $0x478] sm:$0xff] %v153_v15  ;;  %v192_v54 = vld [vmem:[%s904_s30 + $0x1b0] sm:$0xff]  ;;  %v193_v55 = vld [vmem:[%s904_s30 + $0x1b8] sm:$0xff] }
  0x50   : > { %218 = vst [vmem:[%s914_s27 + $0x80] sm:$0xff] %v154_v16  ;;  %532 = vst [vmem:[%s914_s27 + $0x280] sm:$0xff] %v154_v16  ;;  %v194_v56 = vld [vmem:[%s904_s30 + $0x1c0] sm:$0xff]  ;;  %v195_v57 = vld [vmem:[%s904_s30 + $0x1c8] sm:$0xff] }
  0x51   : > { %596 = vst [vmem:[%s914_s27 + $0x480] sm:$0xff] %v154_v16  ;;  %219 = vst [vmem:[%s914_s27 + $0x88] sm:$0xff] %v155_v17  ;;  %v196_v58 = vld [vmem:[%s904_s30 + $0x1d0] sm:$0xff]  ;;  %v197_v59 = vld [vmem:[%s904_s30 + $0x1d8] sm:$0xff] }
  0x52   : > { %533 = vst [vmem:[%s914_s27 + $0x288] sm:$0xff] %v155_v17  ;;  %597 = vst [vmem:[%s914_s27 + $0x488] sm:$0xff] %v155_v17  ;;  %v198_v60 = vld [vmem:[%s904_s30 + $0x1e0] sm:$0xff]  ;;  %v199_v61 = vld [vmem:[%s904_s30 + $0x1e8] sm:$0xff] }
  0x53   : > { %220 = vst [vmem:[%s914_s27 + $0x90] sm:$0xff] %v156_v18  ;;  %534 = vst [vmem:[%s914_s27 + $0x290] sm:$0xff] %v156_v18  ;;  %v200_v62 = vld [vmem:[%s904_s30 + $0x1f0] sm:$0xff]  ;;  %v201_v63 = vld [vmem:[%s904_s30 + $0x1f8] sm:$0xff] }
  0x54   : > { %598 = vst [vmem:[%s914_s27 + $0x490] sm:$0xff] %v156_v18  ;;  %221 = vst [vmem:[%s914_s27 + $0x98] sm:$0xff] %v157_v19 }
  0x55   : > { %535 = vst [vmem:[%s914_s27 + $0x298] sm:$0xff] %v157_v19  ;;  %599 = vst [vmem:[%s914_s27 + $0x498] sm:$0xff] %v157_v19 }
  0x56   : > { %222 = vst [vmem:[%s914_s27 + $0xa0] sm:$0xff] %v158_v20  ;;  %536 = vst [vmem:[%s914_s27 + $0x2a0] sm:$0xff] %v158_v20 }
  0x57   : > { %600 = vst [vmem:[%s914_s27 + $0x4a0] sm:$0xff] %v158_v20  ;;  %223 = vst [vmem:[%s914_s27 + $0xa8] sm:$0xff] %v159_v21 }
  0x58   : > { %537 = vst [vmem:[%s914_s27 + $0x2a8] sm:$0xff] %v159_v21  ;;  %601 = vst [vmem:[%s914_s27 + $0x4a8] sm:$0xff] %v159_v21 }
  0x59   : > { %224 = vst [vmem:[%s914_s27 + $0xb0] sm:$0xff] %v160_v22  ;;  %538 = vst [vmem:[%s914_s27 + $0x2b0] sm:$0xff] %v160_v22 }
  0x5a   : > { %602 = vst [vmem:[%s914_s27 + $0x4b0] sm:$0xff] %v160_v22  ;;  %225 = vst [vmem:[%s914_s27 + $0xb8] sm:$0xff] %v161_v23 }
  0x5b   : > { %539 = vst [vmem:[%s914_s27 + $0x2b8] sm:$0xff] %v161_v23  ;;  %603 = vst [vmem:[%s914_s27 + $0x4b8] sm:$0xff] %v161_v23 }
  0x5c   : > { %226 = vst [vmem:[%s914_s27 + $0xc0] sm:$0xff] %v162_v24  ;;  %540 = vst [vmem:[%s914_s27 + $0x2c0] sm:$0xff] %v162_v24 }
  0x5d   : > { %604 = vst [vmem:[%s914_s27 + $0x4c0] sm:$0xff] %v162_v24  ;;  %227 = vst [vmem:[%s914_s27 + $0xc8] sm:$0xff] %v163_v25 }
  0x5e   : > { %541 = vst [vmem:[%s914_s27 + $0x2c8] sm:$0xff] %v163_v25  ;;  %605 = vst [vmem:[%s914_s27 + $0x4c8] sm:$0xff] %v163_v25 }
  0x5f   : > { %228 = vst [vmem:[%s914_s27 + $0xd0] sm:$0xff] %v164_v26  ;;  %542 = vst [vmem:[%s914_s27 + $0x2d0] sm:$0xff] %v164_v26 }
  0x60   : > { %606 = vst [vmem:[%s914_s27 + $0x4d0] sm:$0xff] %v164_v26  ;;  %229 = vst [vmem:[%s914_s27 + $0xd8] sm:$0xff] %v165_v27 }
  0x61   : > { %543 = vst [vmem:[%s914_s27 + $0x2d8] sm:$0xff] %v165_v27  ;;  %607 = vst [vmem:[%s914_s27 + $0x4d8] sm:$0xff] %v165_v27 }
  0x62   : > { %230 = vst [vmem:[%s914_s27 + $0xe0] sm:$0xff] %v166_v28  ;;  %544 = vst [vmem:[%s914_s27 + $0x2e0] sm:$0xff] %v166_v28 }
  0x63   : > { %608 = vst [vmem:[%s914_s27 + $0x4e0] sm:$0xff] %v166_v28  ;;  %231 = vst [vmem:[%s914_s27 + $0xe8] sm:$0xff] %v167_v29 }
  0x64   : > { %545 = vst [vmem:[%s914_s27 + $0x2e8] sm:$0xff] %v167_v29  ;;  %609 = vst [vmem:[%s914_s27 + $0x4e8] sm:$0xff] %v167_v29 }
  0x65   : > { %232 = vst [vmem:[%s914_s27 + $0xf0] sm:$0xff] %v168_v30  ;;  %546 = vst [vmem:[%s914_s27 + $0x2f0] sm:$0xff] %v168_v30 }
  0x66   : > { %610 = vst [vmem:[%s914_s27 + $0x4f0] sm:$0xff] %v168_v30  ;;  %233 = vst [vmem:[%s914_s27 + $0xf8] sm:$0xff] %v169_v31 }
  0x67   : > { %547 = vst [vmem:[%s914_s27 + $0x2f8] sm:$0xff] %v169_v31  ;;  %611 = vst [vmem:[%s914_s27 + $0x4f8] sm:$0xff] %v169_v31 }
  0x68   : > { %234 = vst [vmem:[%s914_s27 + $0x100] sm:$0xff] %v170_v32  ;;  %548 = vst [vmem:[%s914_s27 + $0x300] sm:$0xff] %v170_v32 }
  0x69   : > { %612 = vst [vmem:[%s914_s27 + $0x500] sm:$0xff] %v170_v32  ;;  %235 = vst [vmem:[%s914_s27 + $0x108] sm:$0xff] %v171_v33 }
  0x6a   : > { %549 = vst [vmem:[%s914_s27 + $0x308] sm:$0xff] %v171_v33  ;;  %613 = vst [vmem:[%s914_s27 + $0x508] sm:$0xff] %v171_v33 }
  0x6b   : > { %236 = vst [vmem:[%s914_s27 + $0x110] sm:$0xff] %v172_v34  ;;  %550 = vst [vmem:[%s914_s27 + $0x310] sm:$0xff] %v172_v34 }
  0x6c   : > { %614 = vst [vmem:[%s914_s27 + $0x510] sm:$0xff] %v172_v34  ;;  %237 = vst [vmem:[%s914_s27 + $0x118] sm:$0xff] %v173_v35 }
  0x6d   : > { %551 = vst [vmem:[%s914_s27 + $0x318] sm:$0xff] %v173_v35  ;;  %615 = vst [vmem:[%s914_s27 + $0x518] sm:$0xff] %v173_v35 }
  0x6e   : > { %238 = vst [vmem:[%s914_s27 + $0x120] sm:$0xff] %v174_v36  ;;  %552 = vst [vmem:[%s914_s27 + $0x320] sm:$0xff] %v174_v36 }
  0x6f   : > { %616 = vst [vmem:[%s914_s27 + $0x520] sm:$0xff] %v174_v36  ;;  %239 = vst [vmem:[%s914_s27 + $0x128] sm:$0xff] %v175_v37 }
  0x70   : > { %553 = vst [vmem:[%s914_s27 + $0x328] sm:$0xff] %v175_v37  ;;  %617 = vst [vmem:[%s914_s27 + $0x528] sm:$0xff] %v175_v37 }
  0x71   : > { %240 = vst [vmem:[%s914_s27 + $0x130] sm:$0xff] %v176_v38  ;;  %554 = vst [vmem:[%s914_s27 + $0x330] sm:$0xff] %v176_v38 }
  0x72   : > { %618 = vst [vmem:[%s914_s27 + $0x530] sm:$0xff] %v176_v38  ;;  %241 = vst [vmem:[%s914_s27 + $0x138] sm:$0xff] %v177_v39 }
  0x73   : > { %555 = vst [vmem:[%s914_s27 + $0x338] sm:$0xff] %v177_v39  ;;  %619 = vst [vmem:[%s914_s27 + $0x538] sm:$0xff] %v177_v39 }
  0x74   : > { %242 = vst [vmem:[%s914_s27 + $0x140] sm:$0xff] %v178_v40  ;;  %556 = vst [vmem:[%s914_s27 + $0x340] sm:$0xff] %v178_v40 }
  0x75   : > { %620 = vst [vmem:[%s914_s27 + $0x540] sm:$0xff] %v178_v40  ;;  %243 = vst [vmem:[%s914_s27 + $0x148] sm:$0xff] %v179_v41 }
  0x76   : > { %557 = vst [vmem:[%s914_s27 + $0x348] sm:$0xff] %v179_v41  ;;  %621 = vst [vmem:[%s914_s27 + $0x548] sm:$0xff] %v179_v41 }
  0x77   : > { %244 = vst [vmem:[%s914_s27 + $0x150] sm:$0xff] %v180_v42  ;;  %558 = vst [vmem:[%s914_s27 + $0x350] sm:$0xff] %v180_v42 }
  0x78   : > { %622 = vst [vmem:[%s914_s27 + $0x550] sm:$0xff] %v180_v42  ;;  %245 = vst [vmem:[%s914_s27 + $0x158] sm:$0xff] %v181_v43 }
  0x79   : > { %559 = vst [vmem:[%s914_s27 + $0x358] sm:$0xff] %v181_v43  ;;  %623 = vst [vmem:[%s914_s27 + $0x558] sm:$0xff] %v181_v43 }
  0x7a   : > { %246 = vst [vmem:[%s914_s27 + $0x160] sm:$0xff] %v182_v44  ;;  %560 = vst [vmem:[%s914_s27 + $0x360] sm:$0xff] %v182_v44 }
  0x7b   : > { %624 = vst [vmem:[%s914_s27 + $0x560] sm:$0xff] %v182_v44  ;;  %247 = vst [vmem:[%s914_s27 + $0x168] sm:$0xff] %v183_v45 }
  0x7c   : > { %561 = vst [vmem:[%s914_s27 + $0x368] sm:$0xff] %v183_v45  ;;  %625 = vst [vmem:[%s914_s27 + $0x568] sm:$0xff] %v183_v45 }
  0x7d   : > { %248 = vst [vmem:[%s914_s27 + $0x170] sm:$0xff] %v184_v46  ;;  %562 = vst [vmem:[%s914_s27 + $0x370] sm:$0xff] %v184_v46 }
  0x7e   : > { %626 = vst [vmem:[%s914_s27 + $0x570] sm:$0xff] %v184_v46  ;;  %249 = vst [vmem:[%s914_s27 + $0x178] sm:$0xff] %v185_v47 }
  0x7f   : > { %563 = vst [vmem:[%s914_s27 + $0x378] sm:$0xff] %v185_v47  ;;  %627 = vst [vmem:[%s914_s27 + $0x578] sm:$0xff] %v185_v47 }
  0x80   : > { %250 = vst [vmem:[%s914_s27 + $0x180] sm:$0xff] %v186_v48  ;;  %564 = vst [vmem:[%s914_s27 + $0x380] sm:$0xff] %v186_v48 }
  0x81   : > { %628 = vst [vmem:[%s914_s27 + $0x580] sm:$0xff] %v186_v48  ;;  %251 = vst [vmem:[%s914_s27 + $0x188] sm:$0xff] %v187_v49 }
  0x82   : > { %565 = vst [vmem:[%s914_s27 + $0x388] sm:$0xff] %v187_v49  ;;  %629 = vst [vmem:[%s914_s27 + $0x588] sm:$0xff] %v187_v49 }
  0x83   : > { %252 = vst [vmem:[%s914_s27 + $0x190] sm:$0xff] %v188_v50  ;;  %566 = vst [vmem:[%s914_s27 + $0x390] sm:$0xff] %v188_v50 }
  0x84   : > { %630 = vst [vmem:[%s914_s27 + $0x590] sm:$0xff] %v188_v50  ;;  %253 = vst [vmem:[%s914_s27 + $0x198] sm:$0xff] %v189_v51 }
  0x85   : > { %567 = vst [vmem:[%s914_s27 + $0x398] sm:$0xff] %v189_v51  ;;  %631 = vst [vmem:[%s914_s27 + $0x598] sm:$0xff] %v189_v51 }
  0x86   : > { %254 = vst [vmem:[%s914_s27 + $0x1a0] sm:$0xff] %v190_v52  ;;  %568 = vst [vmem:[%s914_s27 + $0x3a0] sm:$0xff] %v190_v52 }
  0x87   : > { %632 = vst [vmem:[%s914_s27 + $0x5a0] sm:$0xff] %v190_v52  ;;  %255 = vst [vmem:[%s914_s27 + $0x1a8] sm:$0xff] %v191_v53 }
  0x88   : > { %569 = vst [vmem:[%s914_s27 + $0x3a8] sm:$0xff] %v191_v53  ;;  %633 = vst [vmem:[%s914_s27 + $0x5a8] sm:$0xff] %v191_v53 }
  0x89   : > { %256 = vst [vmem:[%s914_s27 + $0x1b0] sm:$0xff] %v192_v54  ;;  %570 = vst [vmem:[%s914_s27 + $0x3b0] sm:$0xff] %v192_v54 }
  0x8a   : > { %634 = vst [vmem:[%s914_s27 + $0x5b0] sm:$0xff] %v192_v54  ;;  %257 = vst [vmem:[%s914_s27 + $0x1b8] sm:$0xff] %v193_v55 }
  0x8b   : > { %571 = vst [vmem:[%s914_s27 + $0x3b8] sm:$0xff] %v193_v55  ;;  %635 = vst [vmem:[%s914_s27 + $0x5b8] sm:$0xff] %v193_v55 }
  0x8c   : > { %258 = vst [vmem:[%s914_s27 + $0x1c0] sm:$0xff] %v194_v56  ;;  %572 = vst [vmem:[%s914_s27 + $0x3c0] sm:$0xff] %v194_v56 }
  0x8d   : > { %636 = vst [vmem:[%s914_s27 + $0x5c0] sm:$0xff] %v194_v56  ;;  %259 = vst [vmem:[%s914_s27 + $0x1c8] sm:$0xff] %v195_v57 }
  0x8e   : > { %573 = vst [vmem:[%s914_s27 + $0x3c8] sm:$0xff] %v195_v57  ;;  %637 = vst [vmem:[%s914_s27 + $0x5c8] sm:$0xff] %v195_v57 }
  0x8f   : > { %260 = vst [vmem:[%s914_s27 + $0x1d0] sm:$0xff] %v196_v58  ;;  %574 = vst [vmem:[%s914_s27 + $0x3d0] sm:$0xff] %v196_v58 }
  0x90   : > { %638 = vst [vmem:[%s914_s27 + $0x5d0] sm:$0xff] %v196_v58  ;;  %261 = vst [vmem:[%s914_s27 + $0x1d8] sm:$0xff] %v197_v59 }
  0x91   : > { %575 = vst [vmem:[%s914_s27 + $0x3d8] sm:$0xff] %v197_v59  ;;  %639 = vst [vmem:[%s914_s27 + $0x5d8] sm:$0xff] %v197_v59 }
  0x92   : > { %262 = vst [vmem:[%s914_s27 + $0x1e0] sm:$0xff] %v198_v60  ;;  %576 = vst [vmem:[%s914_s27 + $0x3e0] sm:$0xff] %v198_v60 }
  0x93   : > { %640 = vst [vmem:[%s914_s27 + $0x5e0] sm:$0xff] %v198_v60  ;;  %263 = vst [vmem:[%s914_s27 + $0x1e8] sm:$0xff] %v199_v61 }
  0x94   : > { %577 = vst [vmem:[%s914_s27 + $0x3e8] sm:$0xff] %v199_v61  ;;  %641 = vst [vmem:[%s914_s27 + $0x5e8] sm:$0xff] %v199_v61 }
  0x95   : > { %264 = vst [vmem:[%s914_s27 + $0x1f0] sm:$0xff] %v200_v62  ;;  %578 = vst [vmem:[%s914_s27 + $0x3f0] sm:$0xff] %v200_v62 }
  0x96   : > { %642 = vst [vmem:[%s914_s27 + $0x5f0] sm:$0xff] %v200_v62  ;;  %265 = vst [vmem:[%s914_s27 + $0x1f8] sm:$0xff] %v201_v63 }
  0x97   : > { %579 = vst [vmem:[%s914_s27 + $0x3f8] sm:$0xff] %v201_v63  ;;  %643 = vst [vmem:[%s914_s27 + $0x5f8] sm:$0xff] %v201_v63 }
  0x98   : > { %s652_s28 = sshll.u32 %s824_s10, 13  ;;  %s421_s29 = sshll.u32 %s914_s27, 4  ;;  %s422_s29 = int_to_ptr.vmem [resolvable:$true] %s421_s29 }
  0x99   : > { %s410_s4 = scalar_lea.hbm %s1208_s1, %s652_s28  ;;  %s786_s5 = smov 8192  }
  0x9a   : > { %p1217_p11 = scmp.ne.s32.totalorder %s1213_s18, 0  ;;  %s787_s11 = smov 16384  }
  0x9b   : > { %s788_s13 = smov 2   ;;  %s789_s14 = smov 4096  }
  0x9c   : > { %656 = sst [smem:[#allocation7]] (%p1217_p11), %s786_s5  ;;  %s790_s10 = smov 256  }
  0x9d   : > { %657 = sst [smem:[#allocation7 + $0x1]] (%p1217_p11), %s787_s11  ;;  %s791_s16 = smov 131072  }
  0x9e   : > { %658 = sst [smem:[#allocation7 + $0x2]] (%p1217_p11), %s788_s13  ;;  %s792_s20 = smov 0  }
  0x9f   : > { %659 = sst [smem:[#allocation7 + $0x3]] (%p1217_p11), %s789_s14 }
  0xa0   : > { %660 = sst [smem:[#allocation7 + $0x4]] (%p1217_p11), %s789_s14 }
  0xa1   : > { %661 = sst [smem:[#allocation7 + $0x5]] (%p1217_p11), %s790_s10 }
  0xa2   : > { %662 = dma.general (%p1217_p11), %s422_s29, 24576, %s410_s4, %s397_s17, %s791_s16, [#allocation7], %s792_s20, 0  }
  0xa3 PF: > { %s449_s21 = sand.u32 1, %s769_s6   ;;  %p1218_p12 = scmp.ne.s32.totalorder %s1214_s19, 0 }
  0xa4   : > { %p1219_p13 = scmp.ge.s32.totalorder %s781_s9, 2  ;;  %s450_s22 = scalar_lea.sflag [#allocation4], %s449_s21 }
  0xa6   : > { %p669_p4 = pnand %p1219_p13, %p1218_p12 }
  0xa8   : > { %p670_p5 = pneg %p669_p4 }
  0xaa   : > { %764 = dma.done.wait (%p670_p5), %s450_s22, 24576  }
  0xab   : > { %766 = vsyncadd (%p670_p5), %s450_s22, 4294942720  ;;  %p14_p7 = scmp.ge.s32.totalorder %s828_s12, 4   ;;  %s1220_s6 = smov %s773_s7 }
  0xac   : > { %s1221_s7 = smov %s777_s8  ;;  %s1222_s8 = smov %s840_s15 }
  0xad   : > { %s1223_s9 = smov %s828_s12  ;;  %16 = sbr.rel (!%p14_p7) target bundleno = 5 (0x5), region = 76 }
  0xb2   :  { %455 = vsyncpa [#allocation3], 1 }
  0xb3   :  { %457 = vsyncpa [#allocation3 + $0x1], 1 }
  0xb4   :  { %458 = vsyncpa [#allocation4], 1 }
  0xb5   :  { %460 = vsyncpa [#allocation4 + $0x1], 1 }

</bundles_post_ra>
